<compile_context>
chip_gen: v5e
topology: v5e:2x2
jax: 0.10.0
libtpu: 0.0.40
codegen_flags: <defaults>
</compile_context>

<pallas_src>
import functools

import jax
import jax.numpy as jnp
from jax import lax
from jax.experimental import pallas as pl
from jax.experimental.pallas import tpu as pltpu

LANES = 128
MAX_TILE_R = 1024          # 1024 x 128 f32 block = 512 KiB per input per buffer
NUM_CORE_SPLITS = 2        # leading "parallel" grid axis (megacore on v7x)


def _round_up(a: int, m: int) -> int:
    return ((a + m - 1) // m) * m


def _dice_bce_kernel(x_ref, t_ref, out_ref, *, n, tile_r, blk_elems, spc):
    """Accumulates four (8,128) f32 partial-sum slabs into the resident output
    block of shape (32, 128):
        rows  0.. 7 : sum(p*t)    rows  8..15 : sum(p)
        rows 16..23 : sum(t)      rows 24..31 : sum(bce_elementwise)
    where p = sigmoid(x), restricted to the n valid (unpadded) elements."""
    c = pl.program_id(0)            # parallel core-split axis
    i = pl.program_id(1)            # reduction axis (arbitrary)
    logical_blk = c * spc + i       # logical row-block id (may exceed the real
                                    # last block; the input index_map clamps,
                                    # and masking zeroes the duplicate data)
    blk_start = logical_blk * blk_elems   # first flat element of this block

    @pl.when(i == 0)
    def _init():
        out_ref[...] = jnp.zeros_like(out_ref)

    x = x_ref[...].astype(jnp.float32)
    t = t_ref[...].astype(jnp.float32)

    def accumulate(valid):
        # Single transcendental pass: reuse e = exp(-|x|) for sigmoid and BCE.
        e = jnp.exp(-jnp.abs(x))
        p = jnp.where(x >= 0.0, 1.0, e) / (1.0 + e)          # sigmoid(x)
        # binary_cross_entropy(sigmoid(x), t) in the stable logits form:
        #   max(x,0) - x*t + log(1 + exp(-|x|))
        bce = jnp.maximum(x, 0.0) - x * t + jnp.log1p(e)
        pt = p * t
        tt = t
        if valid is not None:
            zero = jnp.zeros_like(x)
            pt = jnp.where(valid, pt, zero)
            p = jnp.where(valid, p, zero)
            tt = jnp.where(valid, tt, zero)
            bce = jnp.where(valid, bce, zero)

        def fold(v):  # (tile_r, 128) -> (8, 128), pure vreg adds (no XLU)
            return jnp.sum(v.reshape(tile_r // 8, 8, LANES), axis=0)

        out_ref[0:8, :] += fold(pt)
        out_ref[8:16, :] += fold(p)
        out_ref[16:24, :] += fold(tt)
        out_ref[24:32, :] += fold(bce)

    needs_mask = (blk_start + blk_elems) > n

    @pl.when(needs_mask)            # only the tail block(s) pay for the mask
    def _tail():
        row = lax.broadcasted_iota(jnp.int32, (tile_r, LANES), 0)
        lane = lax.broadcasted_iota(jnp.int32, (tile_r, LANES), 1)
        flat = blk_start + row * LANES + lane
        accumulate(flat < n)

    @pl.when(jnp.logical_not(needs_mask))   # fast unmasked path for full blocks
    def _full():
        accumulate(None)


@functools.partial(jax.jit, static_argnames=("smooth",))
def dice_bce_loss(inputs, targets, smooth: float = 1.0):
    """inputs: logits (B, C, H, W); targets: probabilities in [0,1] (B, C, H, W).
    Returns (total_loss, {'dice': dice_loss, 'bce': bce}) matching the PyTorch
    DiceBCELoss module."""
    assert inputs.shape == targets.shape
    n = inputs.size

    # Keep native dtype (bf16 stays bf16 -> half the HBM bytes); upcast in-kernel.
    x = inputs.reshape(-1)
    t = targets.reshape(-1)

    # Pad only the < 128 remainder (rare for image tensors; a no-op here).
    # Padded values are masked in-kernel, so the pad value is irrelevant.
    if n % LANES:
        pad = LANES - (n % LANES)
        x = jnp.pad(x, (0, pad))
        t = jnp.pad(t, (0, pad))
    rows = x.size // LANES
    x2 = x.reshape(rows, LANES)
    t2 = t.reshape(rows, LANES)

    tile_r = min(MAX_TILE_R, _round_up(rows, 8))
    blk_elems = tile_r * LANES
    n_blocks = pl.cdiv(rows, tile_r)                 # real row-blocks
    spc = pl.cdiv(n_blocks, NUM_CORE_SPLITS)         # grid steps per core-split
    max_blk = n_blocks - 1

    kernel = functools.partial(_dice_bce_kernel, n=n, tile_r=tile_r,
                               blk_elems=blk_elems, spc=spc)

    # Clamp the row-block index so every DMA stays in bounds; blocks past the
    # real data are fully masked out in-kernel (they contribute exact zeros).
    in_map = lambda c, i: (jnp.minimum(c * spc + i, max_blk), 0)
    in_spec = pl.BlockSpec((tile_r, LANES), in_map)

    partials = pl.pallas_call(
        kernel,
        out_shape=jax.ShapeDtypeStruct((NUM_CORE_SPLITS * 32, LANES), jnp.float32),
        grid_spec=pltpu.PrefetchScalarGridSpec(
            num_scalar_prefetch=0,
            grid=(NUM_CORE_SPLITS, spc),
            in_specs=[in_spec, in_spec],
            out_specs=pl.BlockSpec((32, LANES), lambda c, i: (c, 0)),
        ),
        compiler_params=pltpu.CompilerParams(
            dimension_semantics=("parallel", "arbitrary"),
            vmem_limit_bytes=32 * 1024 * 1024),
    )(x2, t2)

    # Tiny final reduction of the per-split (4, 8, 128) partial slabs.
    sums = partials.reshape(NUM_CORE_SPLITS, 4, 8, LANES).sum(axis=(0, 2, 3))
    intersection, p_sum, t_sum, bce_sum = sums[0], sums[1], sums[2], sums[3]

    dice_loss = 1.0 - (2.0 * intersection + smooth) / (p_sum + t_sum + smooth)
    bce = bce_sum / n
    total = 0.5 * bce + 0.5 * dice_loss
    return total, {"dice": dice_loss, "bce": bce}


def _reference(inputs, targets, smooth=1.0):
    p = jax.nn.sigmoid(inputs.astype(jnp.float32)).reshape(-1)
    t = targets.astype(jnp.float32).reshape(-1)
    intersection = jnp.sum(p * t)
    dice_loss = 1.0 - (2.0 * intersection + smooth) / (jnp.sum(p) + jnp.sum(t) + smooth)
    eps = 1e-12
    bce = jnp.mean(-(t * jnp.log(p + eps) + (1.0 - t) * jnp.log(1.0 - p + eps)))
    return 0.5 * bce + 0.5 * dice_loss, dice_loss, bce


if __name__ == "__main__":
    key = jax.random.PRNGKey(0)
    k1, k2 = jax.random.split(key)
    B, C, H, W = 2, 4, 16, 16
    inputs = jax.random.normal(k1, (B, C, H, W), dtype=jnp.float32)      # logits
    targets = jax.random.uniform(k2, (B, C, H, W), dtype=jnp.float32)    # soft targets in [0,1]

    total, comps = dice_bce_loss(inputs, targets, smooth=1.0)
    jax.block_until_ready(total)
    jax.block_until_ready(comps["dice"])
    jax.block_until_ready(comps["bce"])

    ref_total, ref_dice, ref_bce = _reference(inputs, targets)
    assert jnp.allclose(total, ref_total, atol=1e-4), (total, ref_total)
    assert jnp.allclose(comps["dice"], ref_dice, atol=1e-4), (comps["dice"], ref_dice)
    assert jnp.allclose(comps["bce"], ref_bce, atol=1e-4), (comps["bce"], ref_bce)

    print("KERNEL_OK")
</pallas_src>

<mosaic_0001>
module attributes {stable_mosaic.version = 11 : i64} {
  func.func @_dice_bce_kernel(%arg0: i32, %arg1: i32, %arg2: memref<16x128xf32, #tpu.memory_space<vmem>>, %arg3: memref<16x128xf32, #tpu.memory_space<vmem>>, %arg4: memref<32x128xf32, #tpu.memory_space<vmem>>) attributes {dimension_semantics = [#tpu.dimension_semantics<parallel>, #tpu.dimension_semantics<arbitrary>], iteration_bounds = array<i64: 2, 1>, scalar_prefetch = 0 : i64, scratch_operands = 0 : i64, tpu.core_type = #tpu.core_type<tc>, window_params = [{transform_indices = @transform_0, window_bounds = array<i64: 16, 128>}, {transform_indices = @transform_1, window_bounds = array<i64: 16, 128>}, {transform_indices = @transform_2, window_bounds = array<i64: 32, 128>}]} {
    %c1_i32 = arith.constant 1 : i32
    %0 = arith.muli %arg0, %c1_i32 : i32
    %1 = arith.addi %0, %arg1 : i32
    %c2048_i32 = arith.constant 2048 : i32
    %2 = arith.muli %1, %c2048_i32 : i32
    %c0_i32 = arith.constant 0 : i32
    %3 = arith.cmpi eq, %arg1, %c0_i32 : i32
    %4 = arith.extui %3 : i1 to i32
    %c0_i32_0 = arith.constant 0 : i32
    %5 = arith.cmpi ne, %4, %c0_i32_0 : i32
    scf.if %5 {
      %cst = arith.constant 0.000000e+00 : f32
      %15 = vector.broadcast %cst : f32 to vector<32x128xf32>
      %c0_8 = arith.constant 0 : index
      %c0_9 = arith.constant 0 : index
      %16 = vector.load %arg4[%c0_8, %c0_9] : memref<32x128xf32, #tpu.memory_space<vmem>>, vector<32x128xf32>
      tpu.vector_store %arg4[%c0_8, %c0_9], %15 {strides = array<i32>} : memref<32x128xf32, #tpu.memory_space<vmem>>, vector<32x128xf32>,
    } else {
    }
    %c0 = arith.constant 0 : index
    %c0_1 = arith.constant 0 : index
    %6 = vector.load %arg2[%c0, %c0_1] : memref<16x128xf32, #tpu.memory_space<vmem>>, vector<16x128xf32>
    %c0_2 = arith.constant 0 : index
    %c0_3 = arith.constant 0 : index
    %7 = vector.load %arg3[%c0_2, %c0_3] : memref<16x128xf32, #tpu.memory_space<vmem>>, vector<16x128xf32>
    %c2048_i32_4 = arith.constant 2048 : i32
    %8 = arith.addi %2, %c2048_i32_4 : i32
    %c2048_i32_5 = arith.constant 2048 : i32
    %9 = arith.cmpi sgt, %8, %c2048_i32_5 : i32
    %10 = arith.extui %9 : i1 to i32
    %c0_i32_6 = arith.constant 0 : i32
    %11 = arith.cmpi ne, %10, %c0_i32_6 : i32
    scf.if %11 {
      %15 = tpu.iota {dimensions = array<i32: 0>} : vector<16x128xi32>
      %16 = tpu.iota {dimensions = array<i32: 1>} : vector<16x128xi32>
      %c128_i32 = arith.constant 128 : i32
      %17 = vector.broadcast %c128_i32 : i32 to vector<16x128xi32>
      %18 = arith.muli %15, %17 : vector<16x128xi32>
      %19 = vector.broadcast %2 : i32 to vector<16x128xi32>
      %20 = arith.addi %19, %18 : vector<16x128xi32>
      %21 = arith.addi %20, %16 : vector<16x128xi32>
      %c2048_i32_8 = arith.constant 2048 : i32
      %22 = vector.broadcast %c2048_i32_8 : i32 to vector<16x128xi32>
      %23 = arith.cmpi slt, %21, %22 : vector<16x128xi32>
      %24 = math.absf %6 : vector<16x128xf32>
      %cst = arith.constant 0.000000e+00 : f32
      %25 = vector.broadcast %cst : f32 to vector<16x128xf32>
      %26 = arith.subf %25, %24 : vector<16x128xf32>
      %27 = math.exp %26 : vector<16x128xf32>
      %cst_9 = arith.constant 0.000000e+00 : f32
      %28 = vector.broadcast %cst_9 : f32 to vector<16x128xf32>
      %29 = arith.cmpf oge, %6, %28 : vector<16x128xf32>
      %cst_10 = arith.constant 1.000000e+00 : f32
      %30 = vector.broadcast %cst_10 : f32 to vector<16x128xf32>
      %31 = arith.select %29, %30, %27 : vector<16x128xi1>, vector<16x128xf32>
      %cst_11 = arith.constant 1.000000e+00 : f32
      %32 = vector.broadcast %cst_11 : f32 to vector<16x128xf32>
      %33 = arith.addf %32, %27 : vector<16x128xf32>
      %34 = arith.divf %31, %33 : vector<16x128xf32>
      %cst_12 = arith.constant 0.000000e+00 : f32
      %35 = vector.broadcast %cst_12 : f32 to vector<16x128xf32>
      %36 = arith.maximumf %6, %35 : vector<16x128xf32>
      %37 = arith.mulf %6, %7 : vector<16x128xf32>
      %38 = arith.subf %36, %37 : vector<16x128xf32>
      %39 = math.log1p %27 : vector<16x128xf32>
      %40 = arith.addf %38, %39 : vector<16x128xf32>
      %41 = arith.mulf %34, %7 : vector<16x128xf32>
      %cst_13 = arith.constant 0.000000e+00 : f32
      %42 = vector.broadcast %cst_13 : f32 to vector<16x128xf32>
      %43 = arith.select %23, %41, %42 : vector<16x128xi1>, vector<16x128xf32>
      %44 = arith.select %23, %34, %42 : vector<16x128xi1>, vector<16x128xf32>
      %45 = arith.select %23, %7, %42 : vector<16x128xi1>, vector<16x128xf32>
      %46 = arith.select %23, %40, %42 : vector<16x128xi1>, vector<16x128xf32>
      %c0_14 = arith.constant 0 : index
      %c0_15 = arith.constant 0 : index
      %47 = vector.load %arg4[%c0_14, %c0_15] : memref<32x128xf32, #tpu.memory_space<vmem>>, vector<8x128xf32>
      %48 = vector.shape_cast %43 : vector<16x128xf32> to vector<2x8x128xf32>
      %cst_16 = arith.constant dense<0.000000e+00> : vector<8x128xf32>
      %49 = vector.multi_reduction <add>, %48, %cst_16 [0] : vector<2x8x128xf32> to vector<8x128xf32>
      %50 = arith.addf %47, %49 : vector<8x128xf32>
      %c0_17 = arith.constant 0 : index
      %c0_18 = arith.constant 0 : index
      %51 = vector.load %arg4[%c0_17, %c0_18] : memref<32x128xf32, #tpu.memory_space<vmem>>, vector<8x128xf32>
      tpu.vector_store %arg4[%c0_17, %c0_18], %50 {strides = array<i32>} : memref<32x128xf32, #tpu.memory_space<vmem>>, vector<8x128xf32>,
      %c8 = arith.constant 8 : index
      %c0_19 = arith.constant 0 : index
      %52 = vector.load %arg4[%c8, %c0_19] : memref<32x128xf32, #tpu.memory_space<vmem>>, vector<8x128xf32>
      %53 = vector.shape_cast %44 : vector<16x128xf32> to vector<2x8x128xf32>
      %cst_20 = arith.constant dense<0.000000e+00> : vector<8x128xf32>
      %54 = vector.multi_reduction <add>, %53, %cst_20 [0] : vector<2x8x128xf32> to vector<8x128xf32>
      %55 = arith.addf %52, %54 : vector<8x128xf32>
      %c8_21 = arith.constant 8 : index
      %c0_22 = arith.constant 0 : index
      %56 = vector.load %arg4[%c8_21, %c0_22] : memref<32x128xf32, #tpu.memory_space<vmem>>, vector<8x128xf32>
      tpu.vector_store %arg4[%c8_21, %c0_22], %55 {strides = array<i32>} : memref<32x128xf32, #tpu.memory_space<vmem>>, vector<8x128xf32>,
      %c16 = arith.constant 16 : index
      %c0_23 = arith.constant 0 : index
      %57 = vector.load %arg4[%c16, %c0_23] : memref<32x128xf32, #tpu.memory_space<vmem>>, vector<8x128xf32>
      %58 = vector.shape_cast %45 : vector<16x128xf32> to vector<2x8x128xf32>
      %cst_24 = arith.constant dense<0.000000e+00> : vector<8x128xf32>
      %59 = vector.multi_reduction <add>, %58, %cst_24 [0] : vector<2x8x128xf32> to vector<8x128xf32>
      %60 = arith.addf %57, %59 : vector<8x128xf32>
      %c16_25 = arith.constant 16 : index
      %c0_26 = arith.constant 0 : index
      %61 = vector.load %arg4[%c16_25, %c0_26] : memref<32x128xf32, #tpu.memory_space<vmem>>, vector<8x128xf32>
      tpu.vector_store %arg4[%c16_25, %c0_26], %60 {strides = array<i32>} : memref<32x128xf32, #tpu.memory_space<vmem>>, vector<8x128xf32>,
      %c24 = arith.constant 24 : index
      %c0_27 = arith.constant 0 : index
      %62 = vector.load %arg4[%c24, %c0_27] : memref<32x128xf32, #tpu.memory_space<vmem>>, vector<8x128xf32>
      %63 = vector.shape_cast %46 : vector<16x128xf32> to vector<2x8x128xf32>
      %cst_28 = arith.constant dense<0.000000e+00> : vector<8x128xf32>
      %64 = vector.multi_reduction <add>, %63, %cst_28 [0] : vector<2x8x128xf32> to vector<8x128xf32>
      %65 = arith.addf %62, %64 : vector<8x128xf32>
      %c24_29 = arith.constant 24 : index
      %c0_30 = arith.constant 0 : index
      %66 = vector.load %arg4[%c24_29, %c0_30] : memref<32x128xf32, #tpu.memory_space<vmem>>, vector<8x128xf32>
      tpu.vector_store %arg4[%c24_29, %c0_30], %65 {strides = array<i32>} : memref<32x128xf32, #tpu.memory_space<vmem>>, vector<8x128xf32>,
    } else {
    }
    %true = arith.constant true
    %12 = arith.xori %9, %true : i1
    %13 = arith.extui %12 : i1 to i32
    %c0_i32_7 = arith.constant 0 : i32
    %14 = arith.cmpi ne, %13, %c0_i32_7 : i32
    scf.if %14 {
      %15 = math.absf %6 : vector<16x128xf32>
      %cst = arith.constant 0.000000e+00 : f32
      %16 = vector.broadcast %cst : f32 to vector<16x128xf32>
      %17 = arith.subf %16, %15 : vector<16x128xf32>
      %18 = math.exp %17 : vector<16x128xf32>
      %cst_8 = arith.constant 0.000000e+00 : f32
      %19 = vector.broadcast %cst_8 : f32 to vector<16x128xf32>
      %20 = arith.cmpf oge, %6, %19 : vector<16x128xf32>
      %cst_9 = arith.constant 1.000000e+00 : f32
      %21 = vector.broadcast %cst_9 : f32 to vector<16x128xf32>
      %22 = arith.select %20, %21, %18 : vector<16x128xi1>, vector<16x128xf32>
      %cst_10 = arith.constant 1.000000e+00 : f32
      %23 = vector.broadcast %cst_10 : f32 to vector<16x128xf32>
      %24 = arith.addf %23, %18 : vector<16x128xf32>
      %25 = arith.divf %22, %24 : vector<16x128xf32>
      %cst_11 = arith.constant 0.000000e+00 : f32
      %26 = vector.broadcast %cst_11 : f32 to vector<16x128xf32>
      %27 = arith.maximumf %6, %26 : vector<16x128xf32>
      %28 = arith.mulf %6, %7 : vector<16x128xf32>
      %29 = arith.subf %27, %28 : vector<16x128xf32>
      %30 = math.log1p %18 : vector<16x128xf32>
      %31 = arith.addf %29, %30 : vector<16x128xf32>
      %32 = arith.mulf %25, %7 : vector<16x128xf32>
      %c0_12 = arith.constant 0 : index
      %c0_13 = arith.constant 0 : index
      %33 = vector.load %arg4[%c0_12, %c0_13] : memref<32x128xf32, #tpu.memory_space<vmem>>, vector<8x128xf32>
      %34 = vector.shape_cast %32 : vector<16x128xf32> to vector<2x8x128xf32>
      %cst_14 = arith.constant dense<0.000000e+00> : vector<8x128xf32>
      %35 = vector.multi_reduction <add>, %34, %cst_14 [0] : vector<2x8x128xf32> to vector<8x128xf32>
      %36 = arith.addf %33, %35 : vector<8x128xf32>
      %c0_15 = arith.constant 0 : index
      %c0_16 = arith.constant 0 : index
      %37 = vector.load %arg4[%c0_15, %c0_16] : memref<32x128xf32, #tpu.memory_space<vmem>>, vector<8x128xf32>
      tpu.vector_store %arg4[%c0_15, %c0_16], %36 {strides = array<i32>} : memref<32x128xf32, #tpu.memory_space<vmem>>, vector<8x128xf32>,
      %c8 = arith.constant 8 : index
      %c0_17 = arith.constant 0 : index
      %38 = vector.load %arg4[%c8, %c0_17] : memref<32x128xf32, #tpu.memory_space<vmem>>, vector<8x128xf32>
      %39 = vector.shape_cast %25 : vector<16x128xf32> to vector<2x8x128xf32>
      %cst_18 = arith.constant dense<0.000000e+00> : vector<8x128xf32>
      %40 = vector.multi_reduction <add>, %39, %cst_18 [0] : vector<2x8x128xf32> to vector<8x128xf32>
      %41 = arith.addf %38, %40 : vector<8x128xf32>
      %c8_19 = arith.constant 8 : index
      %c0_20 = arith.constant 0 : index
      %42 = vector.load %arg4[%c8_19, %c0_20] : memref<32x128xf32, #tpu.memory_space<vmem>>, vector<8x128xf32>
      tpu.vector_store %arg4[%c8_19, %c0_20], %41 {strides = array<i32>} : memref<32x128xf32, #tpu.memory_space<vmem>>, vector<8x128xf32>,
      %c16 = arith.constant 16 : index
      %c0_21 = arith.constant 0 : index
      %43 = vector.load %arg4[%c16, %c0_21] : memref<32x128xf32, #tpu.memory_space<vmem>>, vector<8x128xf32>
      %44 = vector.shape_cast %7 : vector<16x128xf32> to vector<2x8x128xf32>
      %cst_22 = arith.constant dense<0.000000e+00> : vector<8x128xf32>
      %45 = vector.multi_reduction <add>, %44, %cst_22 [0] : vector<2x8x128xf32> to vector<8x128xf32>
      %46 = arith.addf %43, %45 : vector<8x128xf32>
      %c16_23 = arith.constant 16 : index
      %c0_24 = arith.constant 0 : index
      %47 = vector.load %arg4[%c16_23, %c0_24] : memref<32x128xf32, #tpu.memory_space<vmem>>, vector<8x128xf32>
      tpu.vector_store %arg4[%c16_23, %c0_24], %46 {strides = array<i32>} : memref<32x128xf32, #tpu.memory_space<vmem>>, vector<8x128xf32>,
      %c24 = arith.constant 24 : index
      %c0_25 = arith.constant 0 : index
      %48 = vector.load %arg4[%c24, %c0_25] : memref<32x128xf32, #tpu.memory_space<vmem>>, vector<8x128xf32>
      %49 = vector.shape_cast %31 : vector<16x128xf32> to vector<2x8x128xf32>
      %cst_26 = arith.constant dense<0.000000e+00> : vector<8x128xf32>
      %50 = vector.multi_reduction <add>, %49, %cst_26 [0] : vector<2x8x128xf32> to vector<8x128xf32>
      %51 = arith.addf %48, %50 : vector<8x128xf32>
      %c24_27 = arith.constant 24 : index
      %c0_28 = arith.constant 0 : index
      %52 = vector.load %arg4[%c24_27, %c0_28] : memref<32x128xf32, #tpu.memory_space<vmem>>, vector<8x128xf32>
      tpu.vector_store %arg4[%c24_27, %c0_28], %51 {strides = array<i32>} : memref<32x128xf32, #tpu.memory_space<vmem>>, vector<8x128xf32>,
    } else {
    }
    return
  }
  func.func @transform_0(%arg0: i32, %arg1: i32) -> (i32, i32) {
    %c1_i32 = arith.constant 1 : i32
    %0 = arith.muli %arg0, %c1_i32 : i32
    %1 = arith.addi %0, %arg1 : i32
    %c0_i32 = arith.constant 0 : i32
    %2 = arith.minsi %1, %c0_i32 : i32
    %c0_i32_0 = arith.constant 0 : i32
    %c0_i32_1 = arith.constant 0 : i32
    return %2, %c0_i32_0 : i32, i32
  }
  func.func @transform_1(%arg0: i32, %arg1: i32) -> (i32, i32) {
    %c1_i32 = arith.constant 1 : i32
    %0 = arith.muli %arg0, %c1_i32 : i32
    %1 = arith.addi %0, %arg1 : i32
    %c0_i32 = arith.constant 0 : i32
    %2 = arith.minsi %1, %c0_i32 : i32
    %c0_i32_0 = arith.constant 0 : i32
    %c0_i32_1 = arith.constant 0 : i32
    return %2, %c0_i32_0 : i32, i32
  }
  func.func @transform_2(%arg0: i32, %arg1: i32) -> (i32, i32) {
    %c0_i32 = arith.constant 0 : i32
    %c0_i32_0 = arith.constant 0 : i32
    return %arg0, %c0_i32 : i32, i32
  }
}

</mosaic_0001>

<bundles_post_ra>
// kernel: dice_bce_loss.1
= control target key start
LH: loop header
LB: loop body
LE: loop exit
PB: predicated region body
PF: predicated region fallthrough
CT: control target
= control target key end

     0   :  { %s626_s9 = smov 0   ;;  %s628_s10 = smov 0   ;;  %s771_s0 = inlined_call_operand.vmem [shape: f32[16,128], index: 0, kind: input, shape index: {}]   ;;  %s772_s1 = inlined_call_operand.vmem [shape: f32[16,128], index: 1, kind: input, shape index: {}]   ;;  %s773_s2 = inlined_call_operand.vmem [shape: f32[64,128], index: 2, kind: output, shape index: {}]  }
   0x1   :  { %s630_s11 = smov 0  }
   0x2 LB: > { %s24_s12 = sadd.s32 1, %s604_s10  ;;  %p525_p0 = scmp.ge.s32.totalorder %s608_s11, 1  ;;  %s608_s11 = sphi %s630_s11, %s12_s11   ;;  %s604_s10 = sphi %s628_s10, %s775_s10   ;;  %s600_s9 = sphi %s626_s9, %s774_s9  }
   0x3   : > { %p26_p1 = scmp.ge.s32.totalorder %s24_s12, 2  ;;  %p160_p2 = scmp.lt.s32.totalorder %s608_s11, 3 }
   0x5   : > { %s777_s12 = smov (%p26_p1, %s24_s12), 0  ;;  %p161_p3 = pnand %p525_p0, %p160_p2 }
   0x6   : > { %p194_p4 = scmp.lt.s32.totalorder (!%p161_p3), %s600_s9, 0  ;;  %s530_s13 = sshll.u32 (!%p161_p3), %s600_s9, 2 }
   0x7   : > { %164 = sbr.rel (%p161_p3) target bundleno = 114 (0x72), region = 28  ;;  %p218_p5 = scmp.lt.s32.totalorder (!%p161_p3), %s530_s13, 7 }
   0x8   : > { %s532_s14 = sshll.u32 (!%p161_p3), %s600_s9, 11 }
   0x9   : > { %s652_s17 = sadd.s32 (!%p161_p3), 2048, %s532_s14 }
   0xa   : > { %p533_p7 = scmp.le.s32.totalorder (!%p161_p3), %s652_s17, 2048 }
   0xc   : > { %s195_s15 = scalar_select %p194_p4, %s600_s9, 0  ;;  %v610_v0 = vmov 0.0  }
   0xd   : > { %s779_s13 = smov (!%p218_p5, %s530_s13), 7 }
   0xe   : > { %s526_s16 = sshll.u32 %s195_s15, 1  ;;  %s531_s18 = sshll.u32 %s779_s13, 3 }
   0xf   : > { %p197_p6 = scmp.lt.s32.totalorder %s526_s16, 1  ;;  %s657_s21 = scalar_lea.vmem %s773_s2, %s531_s18 }
  0x10   : > { %229 = vst [vmem:[%s657_s21] sm:$0xff] %v610_v0 }
  0x11   : > { %s781_s16 = smov (!%p197_p6, %s526_s16), 1  ;;  %230 = vst [vmem:[%s657_s21 + $0x8] sm:$0xff] %v610_v0  ;;  %241 = sbr.rel (%p533_p7) target bundleno = 65 (0x41), region = 36 }
  0x12   : > { %s527_s22 = sshll.u32 %s781_s16, 3  ;;  %231 = vst [vmem:[%s657_s21 + $0x10] sm:$0xff] %v610_v0 }
  0x13   : > { %s200_s25 = scalar_lea.vmem %s771_s0, %s527_s22  ;;  %s212_s28 = scalar_lea.vmem %s772_s1, %s527_s22  ;;  %232 = vst [vmem:[%s657_s21 + $0x18] sm:$0xff] %v610_v0 }
  0x14   : > { %v669_v1 = vld [vmem:[%s200_s25] sm:$0xff]  ;;  %v671_v2 = vld [vmem:[%s200_s25 + $0x8] sm:$0xff] }
  0x15   : > { %v673_v3 = vld [vmem:[%s212_s28] sm:$0xff]  ;;  %v675_v4 = vld [vmem:[%s212_s28 + $0x8] sm:$0xff] }
  0x16   : > { %v256_v5 = vand.u32 2147483647, %v669_v1  ;;  %v257_v6 = vand.u32 2147483647, %v671_v2  ;;  %v242_v11 = vlaneseq  ;;  %v249_v19 = vstv %s532_s14 }
  0x17   : > { %vm264_vm4 = vcmp.ge.f32.partialorder %v669_v1, 0.0  ;;  %vm265_vm5 = vcmp.ge.f32.partialorder %v671_v2, 0.0  ;;  %v336_v54 = vld [vmem:[%s657_s21] sm:$0xff] }
  0x18   : > { %v258_v7 = vsub.f32 0.0, %v256_v5  ;;  %v259_v8 = vsub.f32 0.0, %v257_v6  ;;  %v243_v15 = vshrl.u32 %v242_v11, 7  ;;  %v246_v22 = vand.u32 127, %v242_v11  ;;  %v340_v6 = vld [vmem:[%s657_s21 + $0x8] sm:$0xff] }
  0x19   : > { %v301_v11 = vmax.f32 %v671_v2, 0.0 }
  0x1a   : > { %v260_v9 = vmul.f32 1.442695, %v258_v7  ;;  %v262_v10 = vmul.f32 1.442695, %v259_v8  ;;  %v244_v17 = vadd.s32 8, %v243_v15  ;;  %v247_v18 = vmul.u32 128, %v243_v15 }
  0x1b   : > { %v303_v15 = vmul.f32 %v675_v4, %v671_v2 }
  0x1c   : > { %562 = vpow2.f32 %v260_v9  ;;  %v248_v23 = vmul.u32 128, %v244_v17  ;;  %v250_v25 = vadd.s32 %v249_v19, %v247_v18 }
  0x1d   : > { %564 = vpow2.f32 %v262_v10  ;;  %v300_v10 = vmax.f32 %v669_v1, 0.0 }
  0x1e   : > { %v251_v33 = vadd.s32 %v249_v19, %v248_v23  ;;  %v252_v39 = vadd.s32 %v250_v25, %v246_v22  ;;  %v305_v23 = vsub.f32 %v301_v11, %v303_v15 }
  0x20   : > { %v253_v42 = vadd.s32 %v251_v33, %v246_v22  ;;  %vm254_vm10 = vcmp.lt.s32.totalorder %v252_v39, 2048 }
  0x22   : > { %v680_v12 = vpop.eup %562  ;;  %vm255_vm11 = vcmp.lt.s32.totalorder %v253_v42, 2048 }
  0x23   : > { %v682_v13 = vpop.eup %564  ;;  %v268_v14 = vadd.f32 1.0, %v680_v12  ;;  %v266_v40 = vsel %vm264_vm4, 1.0, %v680_v12  ;;  %v309_v59 = vmul.f32 -0.5, %v680_v12  ;;  %v312_v7 = vand.u32 2147483647, %v680_v12 }
  0x24   : > { %v269_v16 = vadd.f32 1.0, %v682_v13  ;;  %v267_v43 = vsel %vm265_vm5, 1.0, %v682_v13  ;;  %v318_v60 = vmul.f32 -0.5, %v682_v13  ;;  %v321_v8 = vand.u32 2147483647, %v682_v13 }
  0x25   : > { %566 = vrcp.f32 %v268_v14  ;;  %vm275_vm0 = vweird.f32 %v268_v14  ;;  %v281_v26 = vand.u32 2147483648, %v268_v14  ;;  %v279_v29 = vand.u32 2147483647, %v268_v14 }
  0x26   : > { %568 = vrcp.f32 %v269_v16  ;;  %v296_v30 = vand.u32 2147483648, %v269_v16  ;;  %vm290_vm2 = vweird.f32 %v269_v16  ;;  %v294_v32 = vand.u32 2147483647, %v269_v16 }
  0x27   : > { %v282_v35 = vor.u32 1.1754944e-38, %v281_v26  ;;  %vm280_vm7 = vcmp.eq.f32.partialorder %v279_v29, 8.507059e+37  ;;  %570 = vlog2.f32 %v268_v14  ;;  %v310_v63 = vadd.f32 1.0, %v309_v59 }
  0x28   : > { %v297_v38 = vor.u32 1.1754944e-38, %v296_v30  ;;  %vm295_vm9 = vcmp.eq.f32.partialorder %v294_v32, 8.507059e+37  ;;  %572 = vlog2.f32 %v269_v16  ;;  %v319_v0 = vadd.f32 1.0, %v318_v60  ;;  %v348_v32 = vld [vmem:[%s657_s21 + $0x18] sm:$0xff] }
  0x29   : > { %v311_v17 = vmul.f32 %v680_v12, %v310_v63  ;;  %vm313_vm12 = vcmp.lt.f32.partialorder %v312_v7, 0.0004427343  ;;  %vm322_vm13 = vcmp.lt.f32.partialorder %v321_v8, 0.0004427343  ;;  %v344_v12 = vld [vmem:[%s657_s21 + $0x10] sm:$0xff] }
  0x2a   : > { %v320_v19 = vmul.f32 %v682_v13, %v319_v0 }
  0x2b   : > { %v567_v20 = vpop.eup %566 }
  0x2c   : > { %v569_v21 = vpop.eup %568  ;;  %v271_v24 = vmul.f32 %v567_v20, %v268_v14  ;;  %vm276_vm1 = vweird.f32 %v567_v20  ;;  %v302_v14 = vmul.f32 %v673_v3, %v669_v1 }
  0x2d   : > { %v286_v27 = vmul.f32 %v569_v21, %v269_v16  ;;  %vm291_vm3 = vweird.f32 %v569_v21  ;;  %vm277_vm6 = vmor %vm275_vm0, %vm276_vm1  ;;  %v571_v62 = vpop.eup %570 }
  0x2e   : > { %v272_v28 = vsub.f32 1.0, %v271_v24  ;;  %vm292_vm8 = vmor %vm290_vm2, %vm291_vm3  ;;  %v573_v5 = vpop.eup %572  ;;  %v308_v16 = vmul.f32 0.6931472, %v571_v62  ;;  %v304_v22 = vsub.f32 %v300_v10, %v302_v14 }
  0x2f   : > { %v287_v31 = vsub.f32 1.0, %v286_v27  ;;  %v317_v18 = vmul.f32 0.6931472, %v573_v5 }
  0x30   : > { %v273_v34 = vmul.f32 %v567_v20, %v272_v28  ;;  %v314_v25 = vsel %vm313_vm12, %v311_v17, %v308_v16 }
  0x31   : > { %v288_v36 = vmul.f32 %v569_v21, %v287_v31  ;;  %v323_v26 = vsel %vm322_vm13, %v320_v19, %v317_v18  ;;  %v324_v27 = vadd.f32 %v314_v25, %v304_v22 }
  0x32   : > { %v274_v37 = vadd.f32 %v567_v20, %v273_v34  ;;  %v325_v28 = vadd.f32 %v323_v26, %v305_v23 }
  0x33   : > { %v289_v41 = vadd.f32 %v569_v21, %v288_v36  ;;  %v334_v13 = vsel %vm254_vm10, %v324_v27, 0.0 }
  0x34   : > { %v278_v44 = vsel %vm277_vm6, %v567_v20, %v274_v37  ;;  %v332_v20 = vsel %vm254_vm10, %v673_v3, 0.0  ;;  %v335_v30 = vsel %vm255_vm11, %v325_v28, 0.0 }
  0x35   : > { %v283_v45 = vsel %vm280_vm7, %v282_v35, %v278_v44  ;;  %v293_v46 = vsel %vm292_vm8, %v569_v21, %v289_v41  ;;  %v333_v21 = vsel %vm255_vm11, %v675_v4, 0.0  ;;  %v349_v31 = vadd.f32 %v335_v30, %v334_v13 }
  0x36   : > { %v284_v47 = vmul.f32 %v283_v45, %v266_v40  ;;  %v298_v48 = vsel %vm295_vm9, %v297_v38, %v293_v46  ;;  %v345_v24 = vadd.f32 %v333_v21, %v332_v20 }
  0x37   : > { %v299_v49 = vmul.f32 %v298_v48, %v267_v43  ;;  %v350_v33 = vadd.f32 %v349_v31, %v348_v32 }
  0x38   : > { %v326_v50 = vmul.f32 %v284_v47, %v673_v3  ;;  %v330_v57 = vsel %vm254_vm10, %v284_v47, 0.0  ;;  %v346_v29 = vadd.f32 %v345_v24, %v344_v12 }
  0x39   : > { %v327_v51 = vmul.f32 %v299_v49, %v675_v4  ;;  %v331_v58 = vsel %vm255_vm11, %v299_v49, 0.0  ;;  %351 = vst [vmem:[%s657_s21 + $0x18] sm:$0xff] %v350_v33 }
  0x3a   : > { %v328_v52 = vsel %vm254_vm10, %v326_v50, 0.0  ;;  %v341_v61 = vadd.f32 %v331_v58, %v330_v57  ;;  %347 = vst [vmem:[%s657_s21 + $0x10] sm:$0xff] %v346_v29 }
  0x3b   : > { %v329_v53 = vsel %vm255_vm11, %v327_v51, 0.0 }
  0x3c   : > { %v337_v55 = vadd.f32 %v329_v53, %v328_v52  ;;  %v342_v9 = vadd.f32 %v341_v61, %v340_v6 }
  0x3e   : > { %v338_v56 = vadd.f32 %v337_v55, %v336_v54  ;;  %343 = vst [vmem:[%s657_s21 + $0x8] sm:$0xff] %v342_v9 }
  0x40   : > { %339 = vst [vmem:[%s657_s21] sm:$0xff] %v338_v56 }
  0x41 PF: > { %p534_p8 = scmp.gt.s32.totalorder %s652_s17, 2048 }
  0x43   : > { %355 = sbr.rel (%p534_p8) target bundleno = 114 (0x72), region = 40 }
  0x48   : > { %v356_v34 = vand.u32 2147483647, %v669_v1  ;;  %v357_v35 = vand.u32 2147483647, %v671_v2  ;;  %vm364_vm2 = vcmp.ge.f32.partialorder %v669_v1, 0.0  ;;  %vm365_vm3 = vcmp.ge.f32.partialorder %v671_v2, 0.0 }
  0x49   : > { %v428_v10 = vld [vmem:[%s657_s21] sm:$0xff]  ;;  %v432_v18 = vld [vmem:[%s657_s21 + $0x8] sm:$0xff]  ;;  %v400_v26 = vmax.f32 %v669_v1, 0.0  ;;  %v401_v12 = vmax.f32 %v671_v2, 0.0  ;;  %v402_v27 = vmul.f32 %v673_v3, %v669_v1  ;;  %v403_v28 = vmul.f32 %v675_v4, %v671_v2 }
  0x4a   : > { %v358_v36 = vsub.f32 0.0, %v356_v34  ;;  %v359_v37 = vsub.f32 0.0, %v357_v35  ;;  %v437_v32 = vadd.f32 %v675_v4, %v673_v3  ;;  %v436_v35 = vld [vmem:[%s657_s21 + $0x10] sm:$0xff] }
  0x4b   : > { %v404_v33 = vsub.f32 %v400_v26, %v402_v27  ;;  %v405_v34 = vsub.f32 %v401_v12, %v403_v28 }
  0x4c   : > { %v360_v38 = vmul.f32 1.442695, %v358_v36  ;;  %v362_v40 = vmul.f32 1.442695, %v359_v37  ;;  %v438_v37 = vadd.f32 %v437_v32, %v436_v35 }
  0x4e   : > { %574 = vpow2.f32 %v360_v38  ;;  %439 = vst [vmem:[%s657_s21 + $0x10] sm:$0xff] %v438_v37 }
  0x4f   : > { %576 = vpow2.f32 %v362_v40 }
  0x54   : > { %v728_v39 = vpop.eup %574 }
  0x55   : > { %v730_v41 = vpop.eup %576  ;;  %v368_v42 = vadd.f32 1.0, %v728_v39  ;;  %v366_v59 = vsel %vm364_vm2, 1.0, %v728_v39  ;;  %v409_v16 = vmul.f32 -0.5, %v728_v39  ;;  %v412_v24 = vand.u32 2147483647, %v728_v39 }
  0x56   : > { %v369_v43 = vadd.f32 1.0, %v730_v41  ;;  %v367_v61 = vsel %vm365_vm3, 1.0, %v730_v41  ;;  %v418_v17 = vmul.f32 -0.5, %v730_v41  ;;  %v421_v25 = vand.u32 2147483647, %v730_v41 }
  0x57   : > { %578 = vrcp.f32 %v368_v42  ;;  %vm375_vm14 = vweird.f32 %v368_v42  ;;  %v381_v47 = vand.u32 2147483648, %v368_v42  ;;  %v379_v50 = vand.u32 2147483647, %v368_v42 }
  0x58   : > { %580 = vrcp.f32 %v369_v43  ;;  %v396_v51 = vand.u32 2147483648, %v369_v43  ;;  %vm390_vm0 = vweird.f32 %v369_v43  ;;  %v394_v53 = vand.u32 2147483647, %v369_v43 }
  0x59   : > { %v382_v55 = vor.u32 1.1754944e-38, %v381_v47  ;;  %vm380_vm5 = vcmp.eq.f32.partialorder %v379_v50, 8.507059e+37  ;;  %582 = vlog2.f32 %v368_v42  ;;  %v410_v21 = vadd.f32 1.0, %v409_v16 }
  0x5a   : > { %v397_v58 = vor.u32 1.1754944e-38, %v396_v51  ;;  %vm395_vm7 = vcmp.eq.f32.partialorder %v394_v53, 8.507059e+37  ;;  %584 = vlog2.f32 %v369_v43  ;;  %v419_v22 = vadd.f32 1.0, %v418_v17 }
  0x5b   : > { %v411_v13 = vmul.f32 %v728_v39, %v410_v21  ;;  %vm413_vm8 = vcmp.lt.f32.partialorder %v412_v24, 0.0004427343  ;;  %vm422_vm9 = vcmp.lt.f32.partialorder %v421_v25, 0.0004427343  ;;  %v440_v39 = vld [vmem:[%s657_s21 + $0x18] sm:$0xff] }
  0x5c   : > { %v420_v31 = vmul.f32 %v730_v41, %v419_v22 }
  0x5d   : > { %v579_v44 = vpop.eup %578 }
  0x5e   : > { %v581_v45 = vpop.eup %580  ;;  %v371_v46 = vmul.f32 %v579_v44, %v368_v42  ;;  %vm376_vm15 = vweird.f32 %v579_v44 }
  0x5f   : > { %v386_v48 = vmul.f32 %v581_v45, %v369_v43  ;;  %vm391_vm1 = vweird.f32 %v581_v45  ;;  %vm377_vm4 = vmor %vm375_vm14, %vm376_vm15  ;;  %v583_v20 = vpop.eup %582 }
  0x60   : > { %v372_v49 = vsub.f32 1.0, %v371_v46  ;;  %vm392_vm6 = vmor %vm390_vm0, %vm391_vm1  ;;  %v585_v23 = vpop.eup %584  ;;  %v408_v29 = vmul.f32 0.6931472, %v583_v20 }
  0x61   : > { %v387_v52 = vsub.f32 1.0, %v386_v48  ;;  %v417_v30 = vmul.f32 0.6931472, %v585_v23 }
  0x62   : > { %v373_v54 = vmul.f32 %v579_v44, %v372_v49  ;;  %v414_v1 = vsel %vm413_vm8, %v411_v13, %v408_v29 }
  0x63   : > { %v388_v56 = vmul.f32 %v581_v45, %v387_v52  ;;  %v423_v36 = vsel %vm422_vm9, %v420_v31, %v417_v30  ;;  %v424_v2 = vadd.f32 %v414_v1, %v404_v33 }
  0x64   : > { %v374_v57 = vadd.f32 %v579_v44, %v373_v54  ;;  %v425_v38 = vadd.f32 %v423_v36, %v405_v34 }
  0x65   : > { %v389_v60 = vadd.f32 %v581_v45, %v388_v56 }
  0x66   : > { %v378_v62 = vsel %vm377_vm4, %v579_v44, %v374_v57  ;;  %v441_v40 = vadd.f32 %v425_v38, %v424_v2 }
  0x67   : > { %v383_v63 = vsel %vm380_vm5, %v382_v55, %v378_v62  ;;  %v393_v0 = vsel %vm392_vm6, %v581_v45, %v389_v60 }
  0x68   : > { %v384_v5 = vmul.f32 %v383_v63, %v366_v59  ;;  %v398_v6 = vsel %vm395_vm7, %v397_v58, %v393_v0  ;;  %v442_v42 = vadd.f32 %v441_v40, %v440_v39 }
  0x69   : > { %v399_v7 = vmul.f32 %v398_v6, %v367_v61 }
  0x6a   : > { %v426_v8 = vmul.f32 %v384_v5, %v673_v3  ;;  %443 = vst [vmem:[%s657_s21 + $0x18] sm:$0xff] %v442_v42 }
  0x6b   : > { %v427_v9 = vmul.f32 %v399_v7, %v675_v4  ;;  %v433_v15 = vadd.f32 %v399_v7, %v384_v5 }
  0x6d   : > { %v429_v11 = vadd.f32 %v427_v9, %v426_v8  ;;  %v434_v19 = vadd.f32 %v433_v15, %v432_v18 }
  0x6f   : > { %v430_v14 = vadd.f32 %v429_v11, %v428_v10  ;;  %435 = vst [vmem:[%s657_s21 + $0x8] sm:$0xff] %v434_v19 }
  0x71   : > { %431 = vst [vmem:[%s657_s21] sm:$0xff] %v430_v14 }
  0x72 PF: > { %s12_s11 = sadd.s32 1, %s608_s11   ;;  %s774_s9 = smov %s604_s10 }
  0x73   : > { %p9_p9 = scmp.ge.s32.totalorder %s12_s11, 4   ;;  %s775_s10 = smov %s777_s12 }
  0x75   :  { %11 = sbr.rel (!%p9_p9) target bundleno = 2 (0x2), region = 73 }

</bundles_post_ra>
